<compile_context>
chip_gen: v7x
topology: tpu7x:2x2x1
jax: 0.10.0
libtpu: 0.0.40
codegen_flags: <defaults>
</compile_context>

<pallas_src>
import math

import jax
import jax.numpy as jnp
from jax.experimental import pallas as pl
from jax.experimental.pallas import tpu as pltpu

N_TABLES = 21
N_COLUMNS = 35
HIDDEN = 64


def _pad8(n):
    return max(8, ((n + 7) // 8) * 8)


# ---------------------------------------------------------------------------
# Fused kernel: whole Net.forward for a batch of tables + actions.
# ---------------------------------------------------------------------------
def net_kernel(tables_ref, card_ref, sel_ref, cols_ref,
               w1_ref, b1_ref, w2_ref, b2_ref, w3_ref,
               wc_ref, wa1_ref, ba1_ref, wa2_ref, ba2_ref,
               wf1_ref, bf1_ref, wf2_ref, bf2_ref, wf3_ref,
               o_ref):
    h = w3_ref.shape[1]                 # 64
    n_t = tables_ref.shape[0]           # padded #tables
    n_rows = sel_ref.shape[0]           # 2 * padded #actions
    na = n_rows // 2

    # --- table feature extractor (all tables at once, hidden padded to 64) ---
    c = jnp.log(card_ref[...] + 1.0) - 9.0                        # [n_t, 1]
    lane = jax.lax.broadcasted_iota(jnp.int32, (n_t, h), 1)
    last = lane == (h - 1)

    x = jnp.dot(tables_ref[...], w1_ref[...],
                preferred_element_type=jnp.float32) + b1_ref[...]
    x = jnp.maximum(x, 0.0)
    x = jnp.where(last, c, x)            # == cat([relu(fc1), c], dim=1)

    x = jnp.dot(x, w2_ref[...], preferred_element_type=jnp.float32) + b2_ref[...]
    x = jnp.maximum(x, 0.0)
    x = jnp.where(last, c, x)            # == cat([relu(fc2), c], dim=1)

    tf = jnp.dot(x, w3_ref[...], preferred_element_type=jnp.float32)   # [n_t, 64]

    # --- gather per-action table features via one-hot selection on the MXU ---
    tfa = jnp.dot(sel_ref[...], tf, preferred_element_type=jnp.float32)  # [2*na, 64]

    # --- column extractor + aggregate layer, both branches batched together ---
    cf = jnp.dot(cols_ref[...], wc_ref[...], preferred_element_type=jnp.float32)
    wa1 = wa1_ref[...]                   # [128, 64]; split == cat([tf, cf]) @ wa1
    z = (jnp.dot(tfa, wa1[:h, :], preferred_element_type=jnp.float32)
         + jnp.dot(cf, wa1[h:, :], preferred_element_type=jnp.float32)
         + ba1_ref[...])
    z = jnp.maximum(z, 0.0)
    z = jnp.dot(z, wa2_ref[...], preferred_element_type=jnp.float32) + ba2_ref[...]
    z = jnp.maximum(z, 0.0)              # [2*na, 64]

    a1 = z[:na, :]                       # 8-aligned sublane split
    a2 = z[na:, :]

    # --- final layer ---
    wf1 = wf1_ref[...]                   # [128, 64]
    g = (jnp.dot(a1, wf1[:h, :], preferred_element_type=jnp.float32)
         + jnp.dot(a2, wf1[h:, :], preferred_element_type=jnp.float32)
         + bf1_ref[...])
    g = jnp.maximum(g, 0.0)
    g = jnp.dot(g, wf2_ref[...], preferred_element_type=jnp.float32) + bf2_ref[...]
    g = jnp.maximum(g, 0.0)              # [na, 64]

    # [64 -> 1] as VPU multiply + lane reduce; lane-dense (broadcast) output.
    q = jnp.sum(g * wf3_ref[...], axis=-1, keepdims=True)         # [na, 1]
    o_ref[...] = jnp.broadcast_to(q, (na, o_ref.shape[1]))


# ---------------------------------------------------------------------------
# Parameter init (matches weights_init: Linear uniform(+/-sqrt(6/(fi+fo))),
# biases zero). Logical (unpadded) layout; packed/padded for the kernel below.
# ---------------------------------------------------------------------------
def _linear(key, out_f, in_f):
    bound = math.sqrt(6.0 / (in_f + out_f))
    return jax.random.uniform(key, (out_f, in_f), jnp.float32, -bound, bound)


def init_params(key):
    ks = jax.random.split(key, 10)
    h = HIDDEN
    p = {}
    # TableFeatureExtractor
    p["w1"] = _linear(ks[0], h - 1, N_TABLES).T          # [21, 63]
    p["b1"] = jnp.zeros((1, h - 1), jnp.float32)
    p["w2"] = _linear(ks[1], h - 1, h).T                 # [64, 63]
    p["b2"] = jnp.zeros((1, h - 1), jnp.float32)
    p["w3"] = _linear(ks[2], h, h).T                     # [64, 64]
    # column_feature_extractor (no bias)
    p["wc"] = _linear(ks[3], h, N_COLUMNS).T             # [35, 64]
    # aggregate_layer
    p["wa1"] = _linear(ks[4], h, 2 * h).T                # [128, 64]
    p["ba1"] = jnp.zeros((1, h), jnp.float32)
    p["wa2"] = _linear(ks[5], h, h).T                    # [64, 64]
    p["ba2"] = jnp.zeros((1, h), jnp.float32)
    # final_layer
    p["wf1"] = _linear(ks[6], h, 2 * h).T                # [128, 64]
    p["bf1"] = jnp.zeros((1, h), jnp.float32)
    p["wf2"] = _linear(ks[7], h, h).T                    # [64, 64]
    p["bf2"] = jnp.zeros((1, h), jnp.float32)
    p["wf3"] = _linear(ks[8], 1, h).T                    # [64, 1]
    return p


def pack_params(p):
    """Pad the 63-wide hidden path to 64 (zero pad cols / bias lanes) and
    reshape wf3 to a [1, 64] row for the in-kernel lane reduction."""
    h = HIDDEN
    kp = {}
    kp["w1"] = jnp.pad(p["w1"], ((0, 0), (0, 1)))        # [21, 64], col 63 = 0
    kp["b1"] = jnp.pad(p["b1"], ((0, 0), (0, 1)))        # [1, 64],  lane 63 = 0
    kp["w2"] = jnp.pad(p["w2"], ((0, 0), (0, 1)))        # [64, 64], col 63 = 0
    kp["b2"] = jnp.pad(p["b2"], ((0, 0), (0, 1)))        # [1, 64]
    kp["w3"] = p["w3"]
    kp["wc"] = p["wc"]
    kp["wa1"], kp["ba1"], kp["wa2"], kp["ba2"] = p["wa1"], p["ba1"], p["wa2"], p["ba2"]
    kp["wf1"], kp["bf1"], kp["wf2"], kp["bf2"] = p["wf1"], p["bf1"], p["wf2"], p["bf2"]
    kp["wf3"] = p["wf3"].T.reshape(1, h)                 # [1, 64]
    assert kp["w2"].shape == (h, h) and kp["wa1"].shape == (2 * h, h)
    return kp


# ---------------------------------------------------------------------------
# Wrapper: one fused pallas_call (single block, everything resident in VMEM).
# ---------------------------------------------------------------------------
def _vmem_specs(n):
    return [pl.BlockSpec(memory_space=pltpu.MemorySpace.VMEM) for _ in range(n)]


@jax.jit
def net_forward(tables, cardinality, col1, col2, idx, kparams):
    """Batched equivalent of Net.forward.

    tables:      [N_T, n_tables] float32 one-hots
    cardinality: [N_T] float32
    col1, col2:  [N_A, n_columns] float32 column one-hots per action
    idx:         [N_A, 2] int32 table indices (k[0], k[1]) per action
    kparams:     packed params (pack_params(init_params(...)))
    returns:     [N_A, 1] Q values (one per action key)
    """
    n_t, n_a = tables.shape[0], col1.shape[0]
    n_t_pad, n_a_pad = _pad8(n_t), _pad8(n_a)

    tables_p = jnp.pad(tables.astype(jnp.float32), ((0, n_t_pad - n_t), (0, 0)))
    card_p = jnp.pad(cardinality.astype(jnp.float32), (0, n_t_pad - n_t)).reshape(-1, 1)

    # [2*N_A_pad, N_T_pad] one-hot selection (branch 1 rows, then branch 2 rows).
    sel1 = jax.nn.one_hot(idx[:, 0], n_t_pad, dtype=jnp.float32)
    sel2 = jax.nn.one_hot(idx[:, 1], n_t_pad, dtype=jnp.float32)
    pad_a = ((0, n_a_pad - n_a), (0, 0))
    sel = jnp.concatenate([jnp.pad(sel1, pad_a), jnp.pad(sel2, pad_a)], axis=0)
    cols = jnp.concatenate([jnp.pad(col1.astype(jnp.float32), pad_a),
                            jnp.pad(col2.astype(jnp.float32), pad_a)], axis=0)

    kp = kparams
    args = (tables_p, card_p, sel, cols,
            kp["w1"], kp["b1"], kp["w2"], kp["b2"], kp["w3"],
            kp["wc"], kp["wa1"], kp["ba1"], kp["wa2"], kp["ba2"],
            kp["wf1"], kp["bf1"], kp["wf2"], kp["bf2"], kp["wf3"])

    q_pad = pl.pallas_call(
        net_kernel,
        out_shape=jax.ShapeDtypeStruct((n_a_pad, 128), jnp.float32),
        in_specs=_vmem_specs(len(args)),
        out_specs=pl.BlockSpec(memory_space=pltpu.MemorySpace.VMEM),
    )(*args)

    return q_pad[:n_a, 0:1]


# ---------------------------------------------------------------------------
# Pure-JAX reference (mirrors the PyTorch code) for a correctness check.
# ---------------------------------------------------------------------------
def net_forward_ref(tables, cardinality, col1, col2, idx, p):
    c = (jnp.log(cardinality + 1.0) - 9.0).reshape(-1, 1)
    x = jnp.maximum(tables @ p["w1"] + p["b1"], 0.0)
    x = jnp.concatenate([x, c], axis=1)
    x = jnp.maximum(x @ p["w2"] + p["b2"], 0.0)
    x = jnp.concatenate([x, c], axis=1)
    tf = x @ p["w3"]
    tf1, tf2 = tf[idx[:, 0]], tf[idx[:, 1]]
    cf1, cf2 = col1 @ p["wc"], col2 @ p["wc"]

    def agg(t, cf):
        z = jnp.maximum(jnp.concatenate([t, cf], 1) @ p["wa1"] + p["ba1"], 0.0)
        return jnp.maximum(z @ p["wa2"] + p["ba2"], 0.0)

    a1, a2 = agg(tf1, cf1), agg(tf2, cf2)
    g = jnp.maximum(jnp.concatenate([a1, a2], 1) @ p["wf1"] + p["bf1"], 0.0)
    g = jnp.maximum(g @ p["wf2"] + p["bf2"], 0.0)
    return g @ p["wf3"]


if __name__ == "__main__":
    key = jax.random.PRNGKey(0)
    k_param, k_tab, k_card, k_c1, k_c2, k_idx = jax.random.split(key, 6)

    params = init_params(k_param)
    kparams = pack_params(params)

    N_T, N_A = 4, 6  # small synthetic "state": 4 tables, 6 candidate join actions
    tables = (jax.random.uniform(k_tab, (N_T, N_TABLES)) > 0.5).astype(jnp.float32)
    cardinality = jax.random.uniform(k_card, (N_T,), jnp.float32, 1.0, 1.0e6)
    col1 = (jax.random.uniform(k_c1, (N_A, N_COLUMNS)) > 0.5).astype(jnp.float32)
    col2 = (jax.random.uniform(k_c2, (N_A, N_COLUMNS)) > 0.5).astype(jnp.float32)
    idx = jax.random.randint(k_idx, (N_A, 2), 0, N_T, jnp.int32)

    q = net_forward(tables, cardinality, col1, col2, idx, kparams)
    q = jax.block_until_ready(q)

    q_ref = net_forward_ref(tables, cardinality, col1, col2, idx, params)
    assert q.shape == (N_A, 1)
    assert jnp.allclose(q, q_ref, atol=1e-4, rtol=1e-4), (q, q_ref)

    print("KERNEL_OK")
</pallas_src>

<mosaic_0001>
module attributes {stable_mosaic.version = 11 : i64} {
  func.func @net_kernel(%arg0: memref<8x21xf32, #tpu.memory_space<vmem>>, %arg1: memref<8x1xf32, #tpu.memory_space<vmem>>, %arg2: memref<16x8xf32, #tpu.memory_space<vmem>>, %arg3: memref<16x35xf32, #tpu.memory_space<vmem>>, %arg4: memref<21x64xf32, #tpu.memory_space<vmem>>, %arg5: memref<1x64xf32, #tpu.memory_space<vmem>>, %arg6: memref<64x64xf32, #tpu.memory_space<vmem>>, %arg7: memref<1x64xf32, #tpu.memory_space<vmem>>, %arg8: memref<64x64xf32, #tpu.memory_space<vmem>>, %arg9: memref<35x64xf32, #tpu.memory_space<vmem>>, %arg10: memref<128x64xf32, #tpu.memory_space<vmem>>, %arg11: memref<1x64xf32, #tpu.memory_space<vmem>>, %arg12: memref<64x64xf32, #tpu.memory_space<vmem>>, %arg13: memref<1x64xf32, #tpu.memory_space<vmem>>, %arg14: memref<128x64xf32, #tpu.memory_space<vmem>>, %arg15: memref<1x64xf32, #tpu.memory_space<vmem>>, %arg16: memref<64x64xf32, #tpu.memory_space<vmem>>, %arg17: memref<1x64xf32, #tpu.memory_space<vmem>>, %arg18: memref<1x64xf32, #tpu.memory_space<vmem>>, %arg19: memref<8x128xf32, #tpu.memory_space<vmem>>) attributes {dimension_semantics = [], scalar_prefetch = 0 : i64, scratch_operands = 0 : i64, tpu.core_type = #tpu.core_type<tc>} {
    %c0 = arith.constant 0 : index
    %c0_0 = arith.constant 0 : index
    %0 = vector.load %arg1[%c0, %c0_0] : memref<8x1xf32, #tpu.memory_space<vmem>>, vector<8x1xf32>
    %cst = arith.constant 1.000000e+00 : f32
    %1 = vector.broadcast %cst : f32 to vector<8x1xf32>
    %2 = arith.addf %0, %1 : vector<8x1xf32>
    %3 = math.log %2 : vector<8x1xf32>
    %cst_1 = arith.constant 9.000000e+00 : f32
    %4 = vector.broadcast %cst_1 : f32 to vector<8x1xf32>
    %5 = arith.subf %3, %4 : vector<8x1xf32>
    %6 = tpu.iota {dimensions = array<i32: 1>} : vector<8x64xi32>
    %c63_i32 = arith.constant 63 : i32
    %7 = vector.broadcast %c63_i32 : i32 to vector<8x64xi32>
    %8 = arith.cmpi eq, %6, %7 : vector<8x64xi32>
    %c0_2 = arith.constant 0 : index
    %c0_3 = arith.constant 0 : index
    %9 = vector.load %arg0[%c0_2, %c0_3] : memref<8x21xf32, #tpu.memory_space<vmem>>, vector<8x21xf32>
    %c0_4 = arith.constant 0 : index
    %c0_5 = arith.constant 0 : index
    %10 = vector.load %arg4[%c0_4, %c0_5] : memref<21x64xf32, #tpu.memory_space<vmem>>, vector<21x64xf32>
    %cst_6 = arith.constant dense<0.000000e+00> : vector<8x64xf32>
    %11 = tpu.matmul %9, %10, %cst_6 {dimension_numbers = #tpu.dot_dimension_numbers<[1], [0], [0], [1], [0, 0, 1, 1], [], []>} : vector<8x21xf32>, vector<21x64xf32>, vector<8x64xf32> -> vector<8x64xf32>
    %c0_7 = arith.constant 0 : index
    %c0_8 = arith.constant 0 : index
    %12 = vector.load %arg5[%c0_7, %c0_8] : memref<1x64xf32, #tpu.memory_space<vmem>>, vector<1x64xf32>
    %13 = vector.broadcast %12 : vector<1x64xf32> to vector<8x64xf32>
    %14 = arith.addf %11, %13 : vector<8x64xf32>
    %cst_9 = arith.constant 0.000000e+00 : f32
    %15 = vector.broadcast %cst_9 : f32 to vector<8x64xf32>
    %16 = arith.maximumf %14, %15 : vector<8x64xf32>
    %17 = vector.shape_cast %5 : vector<8x1xf32> to vector<8x1xf32>
    %18 = vector.broadcast %17 : vector<8x1xf32> to vector<8x64xf32>
    %19 = arith.select %8, %18, %16 : vector<8x64xi1>, vector<8x64xf32>
    %c0_10 = arith.constant 0 : index
    %c0_11 = arith.constant 0 : index
    %20 = vector.load %arg6[%c0_10, %c0_11] : memref<64x64xf32, #tpu.memory_space<vmem>>, vector<64x64xf32>
    %cst_12 = arith.constant dense<0.000000e+00> : vector<8x64xf32>
    %21 = tpu.matmul %19, %20, %cst_12 {dimension_numbers = #tpu.dot_dimension_numbers<[1], [0], [0], [1], [0, 0, 1, 1], [], []>} : vector<8x64xf32>, vector<64x64xf32>, vector<8x64xf32> -> vector<8x64xf32>
    %c0_13 = arith.constant 0 : index
    %c0_14 = arith.constant 0 : index
    %22 = vector.load %arg7[%c0_13, %c0_14] : memref<1x64xf32, #tpu.memory_space<vmem>>, vector<1x64xf32>
    %23 = vector.broadcast %22 : vector<1x64xf32> to vector<8x64xf32>
    %24 = arith.addf %21, %23 : vector<8x64xf32>
    %cst_15 = arith.constant 0.000000e+00 : f32
    %25 = vector.broadcast %cst_15 : f32 to vector<8x64xf32>
    %26 = arith.maximumf %24, %25 : vector<8x64xf32>
    %27 = vector.shape_cast %5 : vector<8x1xf32> to vector<8x1xf32>
    %28 = vector.broadcast %27 : vector<8x1xf32> to vector<8x64xf32>
    %29 = arith.select %8, %28, %26 : vector<8x64xi1>, vector<8x64xf32>
    %c0_16 = arith.constant 0 : index
    %c0_17 = arith.constant 0 : index
    %30 = vector.load %arg8[%c0_16, %c0_17] : memref<64x64xf32, #tpu.memory_space<vmem>>, vector<64x64xf32>
    %cst_18 = arith.constant dense<0.000000e+00> : vector<8x64xf32>
    %31 = tpu.matmul %29, %30, %cst_18 {dimension_numbers = #tpu.dot_dimension_numbers<[1], [0], [0], [1], [0, 0, 1, 1], [], []>} : vector<8x64xf32>, vector<64x64xf32>, vector<8x64xf32> -> vector<8x64xf32>
    %c0_19 = arith.constant 0 : index
    %c0_20 = arith.constant 0 : index
    %32 = vector.load %arg2[%c0_19, %c0_20] : memref<16x8xf32, #tpu.memory_space<vmem>>, vector<16x8xf32>
    %cst_21 = arith.constant dense<0.000000e+00> : vector<16x64xf32>
    %33 = tpu.matmul %32, %31, %cst_21 {dimension_numbers = #tpu.dot_dimension_numbers<[1], [0], [0], [1], [0, 0, 1, 1], [], []>} : vector<16x8xf32>, vector<8x64xf32>, vector<16x64xf32> -> vector<16x64xf32>
    %c0_22 = arith.constant 0 : index
    %c0_23 = arith.constant 0 : index
    %34 = vector.load %arg3[%c0_22, %c0_23] : memref<16x35xf32, #tpu.memory_space<vmem>>, vector<16x35xf32>
    %c0_24 = arith.constant 0 : index
    %c0_25 = arith.constant 0 : index
    %35 = vector.load %arg9[%c0_24, %c0_25] : memref<35x64xf32, #tpu.memory_space<vmem>>, vector<35x64xf32>
    %cst_26 = arith.constant dense<0.000000e+00> : vector<16x64xf32>
    %36 = tpu.matmul %34, %35, %cst_26 {dimension_numbers = #tpu.dot_dimension_numbers<[1], [0], [0], [1], [0, 0, 1, 1], [], []>} : vector<16x35xf32>, vector<35x64xf32>, vector<16x64xf32> -> vector<16x64xf32>
    %c0_27 = arith.constant 0 : index
    %c0_28 = arith.constant 0 : index
    %37 = vector.load %arg10[%c0_27, %c0_28] : memref<128x64xf32, #tpu.memory_space<vmem>>, vector<128x64xf32>
    %38 = vector.extract_strided_slice %37 {offsets = [0, 0], sizes = [64, 64], strides = [1, 1]} : vector<128x64xf32> to vector<64x64xf32>
    %cst_29 = arith.constant dense<0.000000e+00> : vector<16x64xf32>
    %39 = tpu.matmul %33, %38, %cst_29 {dimension_numbers = #tpu.dot_dimension_numbers<[1], [0], [0], [1], [0, 0, 1, 1], [], []>} : vector<16x64xf32>, vector<64x64xf32>, vector<16x64xf32> -> vector<16x64xf32>
    %40 = vector.extract_strided_slice %37 {offsets = [64, 0], sizes = [64, 64], strides = [1, 1]} : vector<128x64xf32> to vector<64x64xf32>
    %cst_30 = arith.constant dense<0.000000e+00> : vector<16x64xf32>
    %41 = tpu.matmul %36, %40, %cst_30 {dimension_numbers = #tpu.dot_dimension_numbers<[1], [0], [0], [1], [0, 0, 1, 1], [], []>} : vector<16x64xf32>, vector<64x64xf32>, vector<16x64xf32> -> vector<16x64xf32>
    %42 = arith.addf %39, %41 : vector<16x64xf32>
    %c0_31 = arith.constant 0 : index
    %c0_32 = arith.constant 0 : index
    %43 = vector.load %arg11[%c0_31, %c0_32] : memref<1x64xf32, #tpu.memory_space<vmem>>, vector<1x64xf32>
    %44 = vector.broadcast %43 : vector<1x64xf32> to vector<16x64xf32>
    %45 = arith.addf %42, %44 : vector<16x64xf32>
    %cst_33 = arith.constant 0.000000e+00 : f32
    %46 = vector.broadcast %cst_33 : f32 to vector<16x64xf32>
    %47 = arith.maximumf %45, %46 : vector<16x64xf32>
    %c0_34 = arith.constant 0 : index
    %c0_35 = arith.constant 0 : index
    %48 = vector.load %arg12[%c0_34, %c0_35] : memref<64x64xf32, #tpu.memory_space<vmem>>, vector<64x64xf32>
    %cst_36 = arith.constant dense<0.000000e+00> : vector<16x64xf32>
    %49 = tpu.matmul %47, %48, %cst_36 {dimension_numbers = #tpu.dot_dimension_numbers<[1], [0], [0], [1], [0, 0, 1, 1], [], []>} : vector<16x64xf32>, vector<64x64xf32>, vector<16x64xf32> -> vector<16x64xf32>
    %c0_37 = arith.constant 0 : index
    %c0_38 = arith.constant 0 : index
    %50 = vector.load %arg13[%c0_37, %c0_38] : memref<1x64xf32, #tpu.memory_space<vmem>>, vector<1x64xf32>
    %51 = vector.broadcast %50 : vector<1x64xf32> to vector<16x64xf32>
    %52 = arith.addf %49, %51 : vector<16x64xf32>
    %cst_39 = arith.constant 0.000000e+00 : f32
    %53 = vector.broadcast %cst_39 : f32 to vector<16x64xf32>
    %54 = arith.maximumf %52, %53 : vector<16x64xf32>
    %55 = vector.extract_strided_slice %54 {offsets = [0, 0], sizes = [8, 64], strides = [1, 1]} : vector<16x64xf32> to vector<8x64xf32>
    %56 = vector.extract_strided_slice %54 {offsets = [8, 0], sizes = [8, 64], strides = [1, 1]} : vector<16x64xf32> to vector<8x64xf32>
    %c0_40 = arith.constant 0 : index
    %c0_41 = arith.constant 0 : index
    %57 = vector.load %arg14[%c0_40, %c0_41] : memref<128x64xf32, #tpu.memory_space<vmem>>, vector<128x64xf32>
    %58 = vector.extract_strided_slice %57 {offsets = [0, 0], sizes = [64, 64], strides = [1, 1]} : vector<128x64xf32> to vector<64x64xf32>
    %cst_42 = arith.constant dense<0.000000e+00> : vector<8x64xf32>
    %59 = tpu.matmul %55, %58, %cst_42 {dimension_numbers = #tpu.dot_dimension_numbers<[1], [0], [0], [1], [0, 0, 1, 1], [], []>} : vector<8x64xf32>, vector<64x64xf32>, vector<8x64xf32> -> vector<8x64xf32>
    %60 = vector.extract_strided_slice %57 {offsets = [64, 0], sizes = [64, 64], strides = [1, 1]} : vector<128x64xf32> to vector<64x64xf32>
    %cst_43 = arith.constant dense<0.000000e+00> : vector<8x64xf32>
    %61 = tpu.matmul %56, %60, %cst_43 {dimension_numbers = #tpu.dot_dimension_numbers<[1], [0], [0], [1], [0, 0, 1, 1], [], []>} : vector<8x64xf32>, vector<64x64xf32>, vector<8x64xf32> -> vector<8x64xf32>
    %62 = arith.addf %59, %61 : vector<8x64xf32>
    %c0_44 = arith.constant 0 : index
    %c0_45 = arith.constant 0 : index
    %63 = vector.load %arg15[%c0_44, %c0_45] : memref<1x64xf32, #tpu.memory_space<vmem>>, vector<1x64xf32>
    %64 = vector.broadcast %63 : vector<1x64xf32> to vector<8x64xf32>
    %65 = arith.addf %62, %64 : vector<8x64xf32>
    %cst_46 = arith.constant 0.000000e+00 : f32
    %66 = vector.broadcast %cst_46 : f32 to vector<8x64xf32>
    %67 = arith.maximumf %65, %66 : vector<8x64xf32>
    %c0_47 = arith.constant 0 : index
    %c0_48 = arith.constant 0 : index
    %68 = vector.load %arg16[%c0_47, %c0_48] : memref<64x64xf32, #tpu.memory_space<vmem>>, vector<64x64xf32>
    %cst_49 = arith.constant dense<0.000000e+00> : vector<8x64xf32>
    %69 = tpu.matmul %67, %68, %cst_49 {dimension_numbers = #tpu.dot_dimension_numbers<[1], [0], [0], [1], [0, 0, 1, 1], [], []>} : vector<8x64xf32>, vector<64x64xf32>, vector<8x64xf32> -> vector<8x64xf32>
    %c0_50 = arith.constant 0 : index
    %c0_51 = arith.constant 0 : index
    %70 = vector.load %arg17[%c0_50, %c0_51] : memref<1x64xf32, #tpu.memory_space<vmem>>, vector<1x64xf32>
    %71 = vector.broadcast %70 : vector<1x64xf32> to vector<8x64xf32>
    %72 = arith.addf %69, %71 : vector<8x64xf32>
    %cst_52 = arith.constant 0.000000e+00 : f32
    %73 = vector.broadcast %cst_52 : f32 to vector<8x64xf32>
    %74 = arith.maximumf %72, %73 : vector<8x64xf32>
    %c0_53 = arith.constant 0 : index
    %c0_54 = arith.constant 0 : index
    %75 = vector.load %arg18[%c0_53, %c0_54] : memref<1x64xf32, #tpu.memory_space<vmem>>, vector<1x64xf32>
    %76 = vector.broadcast %75 : vector<1x64xf32> to vector<8x64xf32>
    %77 = arith.mulf %74, %76 : vector<8x64xf32>
    %cst_55 = arith.constant dense<0.000000e+00> : vector<8xf32>
    %78 = vector.multi_reduction <add>, %77, %cst_55 [1] : vector<8x64xf32> to vector<8xf32>
    %79 = vector.shape_cast %78 : vector<8xf32> to vector<8x1xf32>
    %80 = vector.shape_cast %79 : vector<8x1xf32> to vector<8x1xf32>
    %81 = vector.broadcast %80 : vector<8x1xf32> to vector<8x128xf32>
    %c0_56 = arith.constant 0 : index
    %c0_57 = arith.constant 0 : index
    %82 = vector.load %arg19[%c0_56, %c0_57] : memref<8x128xf32, #tpu.memory_space<vmem>>, vector<8x128xf32>
    tpu.vector_store %arg19[%c0_56, %c0_57], %81 {strides = array<i32>} : memref<8x128xf32, #tpu.memory_space<vmem>>, vector<8x128xf32>,
    return
  }
}

</mosaic_0001>

<bundles_post_ra>
// kernel: net_forward.1
= control target key start
LH: loop header
LB: loop body
LE: loop exit
PB: predicated region body
PF: predicated region fallthrough
CT: control target
= control target key end

     0   :  { %v1500_v0 = vmov 0.0|0.0   ;;  %vm1501_vm0 = vmmov 0   ;;  %v1502_v3 = vmov 0.0   ;;  %v1503_v5 = vmov 0   ;;  %s1914_s4 = inlined_call_operand.vmem [shape: f32[21,64], index: 4, kind: input, shape index: {}]   ;;  %s1915_s1 = inlined_call_operand.vmem [shape: f32[8,1], index: 1, kind: input, shape index: {}]   ;;  %s1916_s6 = inlined_call_operand.vmem [shape: f32[64,64], index: 6, kind: input, shape index: {}]   ;;  %s1917_s0 = inlined_call_operand.vmem [shape: f32[8,21], index: 0, kind: input, shape index: {}]   ;;  %s1918_s8 = inlined_call_operand.vmem [shape: f32[64,64], index: 8, kind: input, shape index: {}]   ;;  %s1919_s5 = inlined_call_operand.vmem [shape: f32[1,64], index: 5, kind: input, shape index: {}]   ;;  %s1920_s9 = inlined_call_operand.vmem [shape: f32[35,64], index: 9, kind: input, shape index: {}]   ;;  %s1921_s3 = inlined_call_operand.vmem [shape: f32[16,35], index: 3, kind: input, shape index: {}]   ;;  %s1922_s7 = inlined_call_operand.vmem [shape: f32[1,64], index: 7, kind: input, shape index: {}]   ;;  %s1923_s2 = inlined_call_operand.vmem [shape: f32[16,8], index: 2, kind: input, shape index: {}]   ;;  %s1924_s10 = inlined_call_operand.vmem [shape: f32[128,64], index: 10, kind: input, shape index: {}]   ;;  %s1925_s12 = inlined_call_operand.vmem [shape: f32[64,64], index: 12, kind: input, shape index: {}]   ;;  %s1926_s14 = inlined_call_operand.vmem [shape: f32[128,64], index: 14, kind: input, shape index: {}]   ;;  %s1927_s11 = inlined_call_operand.vmem [shape: f32[1,64], index: 11, kind: input, shape index: {}]   ;;  %s1928_s13 = inlined_call_operand.vmem [shape: f32[1,64], index: 13, kind: input, shape index: {}]   ;;  %s1929_s16 = inlined_call_operand.vmem [shape: f32[64,64], index: 16, kind: input, shape index: {}]   ;;  %s1930_s15 = inlined_call_operand.vmem [shape: f32[1,64], index: 15, kind: input, shape index: {}]   ;;  %s1931_s17 = inlined_call_operand.vmem [shape: f32[1,64], index: 17, kind: input, shape index: {}]   ;;  %s1932_s18 = inlined_call_operand.vmem [shape: f32[1,64], index: 18, kind: input, shape index: {}]   ;;  %s1933_s19 = inlined_call_operand.vmem [shape: f32[8,128], index: 19, kind: output, shape index: {}]  }
   0x1   :  { %1936 = sst [smem:[#allocation2_spill]] %s1914_s4  ;;  %1372 = vmatprep.subr.bf16.mxu0 %v1500_v0  ;;  %1199 = vmatprep.mubr.msk.f32.mxu0 %vm1501_vm0, %v1502_v3  ;;  %vm85_vm1 = vcmask 1044480   ;;  %vm81_vm2 = vcmask 171008   ;;  %v257_v25 = vld [vmem:[%s1918_s8] sm:$0xff]  ;;  %v258_v26 = vld [vmem:[%s1918_s8 + $0x8] sm:$0xff]  ;;  %v259_v27 = vld [vmem:[%s1918_s8 + $0x10] sm:$0xff]  ;;  %v67_v34 = vlaneseq }
   0x2   :  { %1937 = sst [smem:[#allocation3_spill]] %s1915_s1  ;;  %s1940_s20 = sld [smem:[#allocation2_spill]]  ;;  %1497 = vset.pattern.permute.xlu0 %v1503_v5  ;;  %1375 = vmatprep.subr.bf16.mxu1 %v1500_v0  ;;  %v1388_v28 = vpack.c.bf16 %v258_v26, %v257_v25  ;;  %v260_v29 = vld [vmem:[%s1918_s8 + $0x18] sm:$0xff]  ;;  %v261_v31 = vld [vmem:[%s1918_s8 + $0x20] sm:$0xff]  ;;  %v262_v32 = vld [vmem:[%s1918_s8 + $0x28] sm:$0xff]  ;;  %vm181_vm4 = vcmask 523264  }
   0x3   :  { %1938 = sst [smem:[#allocation4_spill]] %s1916_s6  ;;  %s1941_s23 = sld [smem:[#allocation3_spill]]  ;;  %1218 = vmatprep.mubr.msk.f32.mxu1 %vm1501_vm0, %v1502_v3  ;;  %v1391_v30 = vpack.c.bf16 %v260_v29, %v259_v27  ;;  %v1394_v33 = vpack.c.bf16 %v262_v32, %v261_v31  ;;  %v1079_v35 = vld [vmem:[%s1919_s5] ss:$0 sm:$0xff]  ;;  %v68_v36 = vand.u32 127, %v67_v34  ;;  %v263_v43 = vld [vmem:[%s1918_s8 + $0x30] sm:$0xff] }
   0x4   :  { %1939 = sst [smem:[#allocation5_spill]] %s1917_s0  ;;  %s1942_s0 = sld [smem:[#allocation4_spill]]  ;;  %v264_v44 = vld [vmem:[%s1918_s8 + $0x38] sm:$0xff]  ;;  %vm429_vm5 = vcmask 285696   ;;  %v424_v46 = vld [vmem:[%s1920_s9] sm:$0xff]  ;;  %v425_v47 = vld [vmem:[%s1920_s9 + $0x8] sm:$0xff] }
   0x5   :  { %vm69_vm3 = vcmp.eq.s32.totalorder %v68_v36, 63  ;;  %v1397_v45 = vpack.c.bf16 %v264_v44, %v263_v43  ;;  %v426_v48 = vld [vmem:[%s1920_s9 + $0x10] sm:$0xff]  ;;  %v1399_v49 = vpack.c.bf16 %v425_v47, %v424_v46  ;;  %v427_v50 = vld [vmem:[%s1920_s9 + $0x18] sm:$0xff]  ;;  %v422_v51 = vld [vmem:[%s1921_s3] sm:$0xff]  ;;  %vm436_vm6 = vcmask 1042432  }
   0x6   :  { %v1403_v52 = vpack.c.bf16 %v427_v50, %v426_v48  ;;  %v428_v53 = vld [vmem:[%s1920_s9 + $0x20] sm:$0x7]  ;;  %v423_v54 = vld [vmem:[%s1921_s3 + $0x8] sm:$0xff]  ;;  %vm340_vm7 = vcmask 64512   ;;  %v526_v5 = vld [vmem:[%s1924_s10 + $0x58] sm:$0xff] }
   0x7   :  { %v1082_v55 = vld [vmem:[%s1922_s7] ss:$0 sm:$0xff]  ;;  %v521_v26 = vld [vmem:[%s1924_s10 + $0x30] sm:$0xff]  ;;  %v522_v27 = vld [vmem:[%s1924_s10 + $0x38] sm:$0xff] }
   0x8   :  { %v71_v1 = vld [vmem:[%s1940_s20] sm:$0xff]  ;;  %v72_v2 = vld [vmem:[%s1940_s20 + $0x8] sm:$0xff]  ;;  %v73_v13 = vld [vmem:[%s1940_s20 + $0x10] sm:$0x1f] }
   0x9   :  { %v1373_v4 = vpack.c.bf16 %v72_v2, %v71_v1  ;;  %v62_v6 = vld [vmem:[%s1941_s23] sm:$0xff]  ;;  %s1943_s23 = sld [smem:[#allocation5_spill]]  ;;  %v524_v2 = vld [vmem:[%s1924_s10 + $0x48] sm:$0xff]  ;;  %v706_v31 = vld [vmem:[%s1925_s12 + $0x10] sm:$0xff] }
   0xa   :  { %v166_v7 = vld [vmem:[%s1942_s0] sm:$0xff]  ;;  %v63_v8 = vadd.f32 1.0, %v62_v6  ;;  %v167_v9 = vld [vmem:[%s1942_s0 + $0x8] sm:$0xff]  ;;  %v168_v10 = vld [vmem:[%s1942_s0 + $0x10] sm:$0xff] }
   0xb   :  { %v169_v11 = vld [vmem:[%s1942_s0 + $0x18] sm:$0xff]  ;;  %1374 = vmatpush3.bf16.msra.mxu0 %v1373_v4  ;;  %v1376_v12 = vpack.c.bf16 %v167_v9, %v166_v7  ;;  %v170_v16 = vld [vmem:[%s1942_s0 + $0x20] sm:$0xff]  ;;  %v171_v17 = vld [vmem:[%s1942_s0 + $0x28] sm:$0xff] }
   0xc   :  { %1197 = vmatprep.subr.mxu0 %v1502_v3  ;;  %1498 = vlog2.f32 %v63_v8  ;;  %v1379_v15 = vpack.c.bf16 %v169_v11, %v168_v10  ;;  %v1382_v18 = vpack.c.bf16 %v171_v17, %v170_v16  ;;  %v172_v22 = vld [vmem:[%s1942_s0 + $0x30] sm:$0xff]  ;;  %v173_v23 = vld [vmem:[%s1942_s0 + $0x38] sm:$0xff]  ;;  %v338_v61 = vld [vmem:[%s1923_s2] sm:$0xff] }
   0xd   :  { %1377 = vmatpush3.bf16.msra.mxu1 %v1376_v12  ;;  %v1385_v24 = vpack.c.bf16 %v173_v23, %v172_v22  ;;  %v523_v1 = vld [vmem:[%s1924_s10 + $0x40] sm:$0xff]  ;;  %v525_v4 = vld [vmem:[%s1924_s10 + $0x50] sm:$0xff]  ;;  %v339_v8 = vld [vmem:[%s1923_s2 + $0x8] sm:$0xff] }
   0xe   :  { %1378 = vmatprep.subr.bf16.mxu1 %v1500_v0  ;;  %v1407_v6 = vpack.c.bf16 %v524_v2, %v523_v1  ;;  %v1411_v10 = vpack.c.bf16 %v526_v5, %v525_v4  ;;  %v527_v11 = vld [vmem:[%s1924_s10 + $0x60] sm:$0xff]  ;;  %v528_v12 = vld [vmem:[%s1924_s10 + $0x68] sm:$0xff]  ;;  %v804_v46 = vld [vmem:[%s1926_s14 + $0x10] sm:$0xff] }
   0xf   :  { %v70_v14 = vld [vmem:[%s1943_s23] sm:$0xff]  ;;  %1198 = vmatpush3.msk.msra.mxu0 %vm85_vm1, %v73_v13  ;;  %v1415_v13 = vpack.c.bf16 %v528_v12, %v527_v11  ;;  %v709_v36 = vld [vmem:[%s1925_s12 + $0x28] sm:$0xff]  ;;  %v805_v47 = vld [vmem:[%s1926_s14 + $0x18] sm:$0xff] }
  0x10   :  { %1200 = vmatmul.mubr.msk.f32.vlgmr.msra.gmra.mrb[0].mxu0 %vm81_vm2, %v70_v14  ;;  %1387 = vmatprep.subr.bf16.mxu0 %v1500_v0  ;;  %v529_v14 = vld [vmem:[%s1924_s10 + $0x70] sm:$0xff]  ;;  %v515_v17 = vld [vmem:[%s1924_s10] sm:$0xff]  ;;  %v803_v44 = vld [vmem:[%s1926_s14 + $0x8] sm:$0xff]  ;;  %v1471_v48 = vpack.c.bf16 %v805_v47, %v804_v46 }
  0x11   :  { %1380 = vmatpush3.bf16.msra.mxu1 %v1379_v15  ;;  %1237 = vmatprep.mubr.msk.f32.mxu0 %vm1501_vm0, %v1502_v3  ;;  %v530_v15 = vld [vmem:[%s1924_s10 + $0x78] sm:$0xff]  ;;  %v519_v23 = vld [vmem:[%s1924_s10 + $0x20] sm:$0xff]  ;;  %v807_v50 = vld [vmem:[%s1926_s14 + $0x28] sm:$0xff] }
  0x12   :  { %1381 = vmatprep.subr.bf16.mxu1 %v1500_v0  ;;  %1389 = vmatpush3.bf16.msra.mxu0 %v1388_v28  ;;  %v1419_v16 = vpack.c.bf16 %v530_v15, %v529_v14  ;;  %v1435_v28 = vpack.c.bf16 %v522_v27, %v521_v26  ;;  %v704_v29 = vld [vmem:[%s1925_s12] sm:$0xff]  ;;  %v815_v4 = vld [vmem:[%s1926_s14 + $0x68] sm:$0xff] }
  0x13   :  { %1390 = vmatprep.subr.bf16.mxu0 %v1500_v0  ;;  %v802_v43 = vld [vmem:[%s1926_s14] sm:$0xff]  ;;  %v974_v14 = vld [vmem:[%s1929_s16 + $0x8] sm:$0xff] }
  0x14   :  { %v814_v2 = vld [vmem:[%s1926_s14 + $0x60] sm:$0xff]  ;;  %v978_v26 = vld [vmem:[%s1929_s16 + $0x28] sm:$0xff] }
  0x15   :  { %1383 = vmatpush3.bf16.msra.mxu1 %v1382_v18  ;;  %v516_v18 = vld [vmem:[%s1924_s10 + $0x8] sm:$0xff]  ;;  %v1462_v5 = vpack.c.bf16 %v815_v4, %v814_v2  ;;  %v1095_v12 = vld [vmem:[%s1928_s13] ss:$0 sm:$0xff] }
  0x16   :  { %v1499_v19 = vpop.eup %1498  ;;  %1384 = vmatprep.subr.bf16.mxu1 %v1500_v0  ;;  %1392 = vmatpush3.bf16.msra.mxu0 %v1391_v30  ;;  %v705_v30 = vld [vmem:[%s1925_s12 + $0x8] sm:$0xff] }
  0x17   :  { %v65_v20 = vmul.f32 0.6931472, %v1499_v19  ;;  %1393 = vmatprep.subr.bf16.mxu0 %v1500_v0  ;;  %v1423_v19 = vpack.c.bf16 %v516_v18, %v515_v17  ;;  %v1439_v32 = vpack.c.bf16 %v705_v30, %v704_v29 }
  0x19   :  { %v1078_v21 = vadd.f32 -9.0, %v65_v20  ;;  %1386 = vmatpush3.bf16.msra.mxu1 %v1385_v24  ;;  %v517_v20 = vld [vmem:[%s1924_s10 + $0x10] sm:$0xff]  ;;  %v520_v24 = vld [vmem:[%s1924_s10 + $0x28] sm:$0xff] }
  0x1a   :  { %1395 = vmatpush3.bf16.msra.mxu0 %v1394_v33  ;;  %1400 = vmatprep.subr.bf16.mxu1 %v1399_v49  ;;  %v1431_v25 = vpack.c.bf16 %v520_v24, %v519_v23  ;;  %v707_v33 = vld [vmem:[%s1925_s12 + $0x18] sm:$0xff] }
  0x1b   :  { %162 = vperm.xlu0 %1497, %v1078_v21   ;;  %1396 = vmatprep.subr.bf16.mxu0 %v1500_v0  ;;  %v518_v21 = vld [vmem:[%s1924_s10 + $0x18] sm:$0xff]  ;;  %v1443_v34 = vpack.c.bf16 %v707_v33, %v706_v31  ;;  %v1100_v33 = vld [vmem:[%s1930_s15] ss:$0 sm:$0xff] }
  0x1c   :  { %v1427_v22 = vpack.c.bf16 %v518_v21, %v517_v20  ;;  %v975_v21 = vld [vmem:[%s1929_s16 + $0x10] sm:$0xff] }
  0x1e   :  { %1398 = vmatpush3.bf16.msra.mxu0 %v1397_v45  ;;  %v1468_v45 = vpack.c.bf16 %v803_v44, %v802_v43 }
  0x9a   :  { %v163_v40 = vpop.permute.xlu0 %162 }
  0xe3   :  { %v155_v37 = vpop.f32.mrb[0].mxu0 }
  0xe4   :  { %v156_v38 = vadd.f32 %v1079_v35, %v155_v37  ;;  %v1201_v39 = vpop.f32.mrb[1].mxu0  ;;  %v708_v35 = vld [vmem:[%s1925_s12 + $0x20] sm:$0xff] }
  0xe5   :  { %v1447_v37 = vpack.c.bf16 %v709_v36, %v708_v35 }
  0xe6   :  { %v159_v41 = vmax.f32 %v156_v38, 0.0 }
  0xe8   :  { %v165_v42 = vsel %vm69_vm3, %v163_v40, %v159_v41  ;;  %v711_v41 = vld [vmem:[%s1925_s12 + $0x38] sm:$0xff] }
  0xe9   :  { %1219 = vmatmul.mubr.msk.f32.vlgmr.msra.gmra.mrb[0].mxu1 %vm181_vm4, %v165_v42 }
  0xea   :  { %1255 = vmatprep.mubr.msk.f32.mxu1 %vm429_vm5, %v422_v51  ;;  %1402 = vmatpush3.bf16.msra.mxu1 %v1399_v49  ;;  %v806_v49 = vld [vmem:[%s1926_s14 + $0x20] sm:$0xff] }
  0xeb   :  { %1404 = vmatprep.subr.bf16.mxu1 %v1403_v52  ;;  %v1474_v51 = vpack.c.bf16 %v807_v50, %v806_v49 }
  0xee   :  { %1406 = vmatpush3.bf16.msra.mxu1 %v1403_v52  ;;  %v1094_v52 = vld [vmem:[%s1927_s11] ss:$0 sm:$0xff] }
  0xef   :  { %1253 = vmatprep.subr.msk.mxu1 %vm436_vm6, %v428_v53 }
  0xf2   :  { %1254 = vmatpush3.msk.msra.mxu1 %vm436_vm6, %v428_v53 }
  0xf3   :  { %1256 = vmatmul.mubr.msk.f32.vlgmr.msra.gmra.mrb[2].mxu1 %vm429_vm5, %v423_v54  ;;  %1440 = vmatprep.subr.bf16.mxu1 %v1439_v32 }
  0xf4   :  { %1442 = vmatpush3.bf16.msra.mxu1 %v1439_v32 }
  0xf5   :  { %1444 = vmatprep.subr.bf16.mxu1 %v1443_v34 }
  0xf8   :  { %1446 = vmatpush3.bf16.msra.mxu1 %v1443_v34 }
  0xf9   :  { %1448 = vmatprep.subr.bf16.mxu1 %v1447_v37 }
  0xfc   :  { %1450 = vmatpush3.bf16.msra.mxu1 %v1447_v37  ;;  %v1101_v37 = vld [vmem:[%s1931_s17] ss:$0 sm:$0xff] }
 0x1bc   :  { %v251_v56 = vpop.f32.mrb[0].mxu1 }
 0x1bd   :  { %v252_v57 = vadd.f32 %v1082_v55, %v251_v56  ;;  %v1220_v58 = vpop.f32.mrb[1].mxu1  ;;  %v810_v56 = vld [vmem:[%s1926_s14 + $0x40] sm:$0xff] }
 0x1bf   :  { %v255_v59 = vmax.f32 %v252_v57, 0.0  ;;  %v811_v57 = vld [vmem:[%s1926_s14 + $0x48] sm:$0xff] }
 0x1c1   :  { %v256_v60 = vsel %vm69_vm3, %v163_v40, %v255_v59  ;;  %v710_v40 = vld [vmem:[%s1925_s12 + $0x30] sm:$0xff] }
 0x1c2   :  { %1238 = vmatmul.mubr.msk.f32.vlgmr.msra.gmra.mrb[2].mxu0 %vm181_vm4, %v256_v60  ;;  %v1451_v42 = vpack.c.bf16 %v711_v41, %v710_v40  ;;  %v1456_v60 = vpack.c.bf16 %v811_v57, %v810_v56  ;;  %v1103_v41 = vld [vmem:[%s1932_s18] ss:$0 sm:$0xff] }
 0x1c3   :  { %1242 = vmatprep.mubr.msk.f32.mxu0 %vm340_vm7, %v338_v61 }
 0x1c4   :  { %1452 = vmatprep.subr.bf16.mxu1 %v1451_v42 }
 0x1c5   :  { %1454 = vmatpush3.bf16.msra.mxu1 %v1451_v42 }
 0x1c6   :  { %v1257_v62 = vpop.f32.mrb[2].mxu1  ;;  %1455 = vmatprep.subr.bf16.mxu1 %v1500_v0 }
 0x1c7   :  { %v506_v63 = vpop.f32.mrb[3].mxu1 }
 0x295   :  { %v334_v7 = vpop.f32.mrb[2].mxu0 }
 0x296   :  { %v1239_v9 = vpop.f32.mrb[3].mxu0  ;;  %1240 = vmatprep.subr.mxu0 %v334_v7 }
 0x297   :  { %1241 = vmatpush3.msra.mxu0 %v334_v7  ;;  %v817_v7 = vld [vmem:[%s1926_s14 + $0x78] sm:$0xff]  ;;  %v808_v9 = vld [vmem:[%s1926_s14 + $0x30] sm:$0xff] }
 0x298   :  { %1243 = vmatmul.mubr.msk.f32.vlgmr.msra.gmra.mrb[4].mxu0 %vm340_vm7, %v339_v8  ;;  %1408 = vmatprep.subr.bf16.mxu0 %v1407_v6 }
 0x299   :  { %1410 = vmatpush3.bf16.msra.mxu0 %v1407_v6  ;;  %1274 = vmatprep.mubr.msk.f32.mxu0 %vm181_vm4, %v506_v63  ;;  %v813_v63 = vld [vmem:[%s1926_s14 + $0x58] sm:$0xff]  ;;  %v816_v6 = vld [vmem:[%s1926_s14 + $0x70] sm:$0xff] }
 0x29a   :  { %1412 = vmatprep.subr.bf16.mxu0 %v1411_v10  ;;  %v1465_v8 = vpack.c.bf16 %v817_v7, %v816_v6 }
 0x29d   :  { %1414 = vmatpush3.bf16.msra.mxu0 %v1411_v10  ;;  %v809_v10 = vld [vmem:[%s1926_s14 + $0x38] sm:$0xff] }
 0x29e   :  { %1416 = vmatprep.subr.bf16.mxu0 %v1415_v13  ;;  %v1477_v11 = vpack.c.bf16 %v809_v10, %v808_v9 }
 0x2a1   :  { %1418 = vmatpush3.bf16.msra.mxu0 %v1415_v13  ;;  %v973_v13 = vld [vmem:[%s1929_s16] sm:$0xff] }
 0x2a2   :  { %1420 = vmatprep.subr.bf16.mxu0 %v1419_v16 }
 0x2a5   :  { %1422 = vmatpush3.bf16.msra.mxu0 %v1419_v16 }
 0x2a6   :  { %1424 = vmatprep.subr.bf16.mxu0 %v1423_v19 }
 0x2a8   :  { %1275 = vmatmul.mubr.msk.f32.vlgmr.msra.gmra.mrb[6].mxu0 %vm181_vm4, %v1257_v62  ;;  %v812_v62 = vld [vmem:[%s1926_s14 + $0x50] sm:$0xff] }
 0x2a9   :  { %1426 = vmatpush3.bf16.msra.mxu0 %v1423_v19  ;;  %v1459_v1 = vpack.c.bf16 %v813_v63, %v812_v62  ;;  %v1480_v19 = vpack.c.bf16 %v974_v14, %v973_v13 }
 0x2aa   :  { %1428 = vmatprep.subr.bf16.mxu0 %v1427_v22 }
 0x2ad   :  { %1430 = vmatpush3.bf16.msra.mxu0 %v1427_v22  ;;  %v976_v22 = vld [vmem:[%s1929_s16 + $0x18] sm:$0xff] }
 0x2ae   :  { %1432 = vmatprep.subr.bf16.mxu0 %v1431_v25  ;;  %v1483_v24 = vpack.c.bf16 %v976_v22, %v975_v21 }
 0x2b1   :  { %1434 = vmatpush3.bf16.msra.mxu0 %v1431_v25  ;;  %v977_v25 = vld [vmem:[%s1929_s16 + $0x20] sm:$0xff] }
 0x2b2   :  { %1436 = vmatprep.subr.bf16.mxu0 %v1435_v28  ;;  %v1486_v27 = vpack.c.bf16 %v978_v26, %v977_v25 }
 0x2b5   :  { %1438 = vmatpush3.bf16.msra.mxu0 %v1435_v28  ;;  %v979_v28 = vld [vmem:[%s1929_s16 + $0x30] sm:$0xff] }
 0x2b6   :  { %1467 = vmatprep.subr.bf16.mxu0 %v1500_v0 }
 0x36b   :  { %v1244_v38 = vpop.f32.mrb[4].mxu0 }
 0x36c   :  { %v413_v39 = vpop.f32.mrb[5].mxu0 }
 0x36d   :  { %1293 = vmatprep.mubr.msk.f32.mxu0 %vm181_vm4, %v413_v39 }
 0x36e   :  { %1294 = vmatmul.mubr.msk.f32.vlgmr.msra.gmra.mrb[6].mxu0 %vm181_vm4, %v1244_v38 }
 0x36f   :  { %1350 = vmatprep.mubr.msk.f32.mxu0 %vm1501_vm0, %v1502_v3  ;;  %1469 = vmatpush3.bf16.msra.mxu0 %v1468_v45 }
 0x370   :  { %1470 = vmatprep.subr.bf16.mxu0 %v1500_v0 }
 0x373   :  { %1472 = vmatpush3.bf16.msra.mxu0 %v1471_v48 }
 0x374   :  { %1473 = vmatprep.subr.bf16.mxu0 %v1500_v0 }
 0x377   :  { %1475 = vmatpush3.bf16.msra.mxu0 %v1474_v51 }
 0x378   :  { %1476 = vmatprep.subr.bf16.mxu0 %v1500_v0 }
 0x37b   :  { %1478 = vmatpush3.bf16.msra.mxu0 %v1477_v11 }
 0x441   :  { %v1295_v53 = vpop.f32.mrb[6].mxu0 }
 0x442   :  { %v701_v54 = vadd.f32 %v1295_v53, %v1094_v52  ;;  %v684_v55 = vpop.f32.mrb[7].mxu0 }
 0x443   :  { %v700_v58 = vadd.f32 %v1094_v52, %v684_v55 }
 0x444   :  { %v703_v61 = vmax.f32 %v701_v54, 0.0 }
 0x445   :  { %v702_v59 = vmax.f32 %v700_v58, 0.0 }
 0x447   :  { %1312 = vmatprep.mubr.msk.f32.mxu1 %vm181_vm4, %v702_v59 }
 0x448   :  { %1313 = vmatmul.mubr.msk.f32.vlgmr.msra.gmra.mrb[4].mxu1 %vm181_vm4, %v703_v61 }
 0x449   :  { %1457 = vmatpush3.bf16.msra.mxu1 %v1456_v60  ;;  %1331 = vmatprep.mubr.msk.f32.mxu1 %vm1501_vm0, %v1502_v3 }
 0x44a   :  { %1458 = vmatprep.subr.bf16.mxu1 %v1500_v0 }
 0x44d   :  { %1460 = vmatpush3.bf16.msra.mxu1 %v1459_v1 }
 0x44e   :  { %1461 = vmatprep.subr.bf16.mxu1 %v1500_v0 }
 0x451   :  { %1463 = vmatpush3.bf16.msra.mxu1 %v1462_v5 }
 0x452   :  { %1464 = vmatprep.subr.bf16.mxu1 %v1500_v0 }
 0x455   :  { %1466 = vmatpush3.bf16.msra.mxu1 %v1465_v8 }
 0x456   :  { %1479 = vmatprep.subr.bf16.mxu1 %v1500_v0 }
 0x51b   :  { %v1314_v15 = vpop.f32.mrb[4].mxu1 }
 0x51c   :  { %v797_v16 = vadd.f32 %v1314_v15, %v1095_v12  ;;  %v791_v17 = vpop.f32.mrb[5].mxu1 }
 0x51d   :  { %v792_v18 = vadd.f32 %v1095_v12, %v791_v17 }
 0x51e   :  { %v801_v20 = vmax.f32 %v797_v16, 0.0 }
 0x51f   :  { %v800_v23 = vmax.f32 %v792_v18, 0.0 }
 0x520   :  { %1332 = vmatmul.mubr.msk.f32.vlgmr.msra.gmra.mrb[6].mxu1 %vm181_vm4, %v801_v20 }
 0x521   :  { %1351 = vmatmul.mubr.msk.f32.vlgmr.msra.gmra.mrb[8].mxu0 %vm181_vm4, %v800_v23  ;;  %1481 = vmatpush3.bf16.msra.mxu1 %v1480_v19 }
 0x522   :  { %1482 = vmatprep.subr.bf16.mxu1 %v1500_v0  ;;  %1369 = vmatprep.mubr.msk.f32.mxu1 %vm1501_vm0, %v1502_v3  ;;  %v980_v3 = vld [vmem:[%s1929_s16 + $0x38] sm:$0xff] }
 0x523   :  { %v1489_v29 = vpack.c.bf16 %v980_v3, %v979_v28 }
 0x525   :  { %1484 = vmatpush3.bf16.msra.mxu1 %v1483_v24 }
 0x526   :  { %1485 = vmatprep.subr.bf16.mxu1 %v1500_v0 }
 0x529   :  { %1487 = vmatpush3.bf16.msra.mxu1 %v1486_v27 }
 0x52a   :  { %1488 = vmatprep.subr.bf16.mxu1 %v1500_v0 }
 0x52d   :  { %1490 = vmatpush3.bf16.msra.mxu1 %v1489_v29 }
 0x5f3   :  { %v887_v30 = vpop.f32.mrb[6].mxu1 }
 0x5f4   :  { %v1333_v31 = vpop.f32.mrb[7].mxu1  ;;  %v960_v32 = vpop.f32.mrb[8].mxu0 }
 0x5f5   :  { %v961_v34 = vadd.f32 %v960_v32, %v887_v30  ;;  %v1352_v35 = vpop.f32.mrb[9].mxu0 }
 0x5f7   :  { %v971_v0 = vadd.f32 %v1100_v33, %v961_v34 }
 0x5f9   :  { %v972_v36 = vmax.f32 %v971_v0, 0.0 }
 0x5fb   :  { %1370 = vmatmul.mubr.msk.f32.vlgmr.msra.gmra.mrb[8].mxu1 %vm181_vm4, %v972_v36 }
 0x6ce   :  { %v1057_v38 = vpop.f32.mrb[8].mxu1 }
 0x6cf   :  { %v1058_v39 = vadd.f32 %v1101_v37, %v1057_v38  ;;  %v1371_v40 = vpop.f32.mrb[9].mxu1 }
 0x6d1   :  { %v1061_v42 = vmax.f32 %v1058_v39, 0.0 }
 0x6d3   :  { %v1069_v43 = vmul.f32 %v1103_v41, %v1061_v42 }
 0x6d5   :  { %v1070_v44 = vsel %vm181_vm4, %v1069_v43, 0.0 }
 0x6d6   :  { %1071 = vadd.xlane.f32.xlu0 %v1070_v44 }
 0x763   :  { %v1072_v45 = vpop.xlane.xlu0 %1071 }
 0x764   :  { %1073 = vst [vmem:[%s1933_s19] sm:$0xff] %v1072_v45 }

</bundles_post_ra>
